<compile_context>
chip_gen: v5e
topology: v5e:2x2
jax: 0.10.0
libtpu: 0.0.40
codegen_flags: <defaults>
</compile_context>

<pallas_src>
import functools

import jax
import jax.numpy as jnp
import numpy as np
from jax.experimental import pallas as pl
from jax.experimental.pallas import tpu as pltpu


# ---------------------------------------------------------------------------
# Kernels
# ---------------------------------------------------------------------------
def _ln2d_kernel_dense(x_ref, g_ref, b_ref, o_ref, *, eps):
    # x_ref: (1, C, S, 128) — spatial on (sublane, lane); channels on a leading dim.
    x = x_ref[...].astype(jnp.float32)
    mean = jnp.mean(x, axis=1, keepdims=True)                  # VPU adds over C vreg tiles
    xc = x - mean
    var = jnp.mean(xc * xc, axis=1, keepdims=True)             # biased var (PyTorch LN)
    inv = jax.lax.rsqrt(var + eps)                             # EUP
    g = g_ref[...].astype(jnp.float32)                         # (1, C, 1, 128)
    b = b_ref[...].astype(jnp.float32)
    o_ref[...] = (xc * inv * g + b).astype(o_ref.dtype)


def _ln2d_kernel_strip(x_ref, g_ref, b_ref, o_ref, *, eps):
    # x_ref: (1, C, T) — channels on sublanes, spatial strip on lanes.
    x = x_ref[0].astype(jnp.float32)                           # (C, T)
    mean = jnp.mean(x, axis=0, keepdims=True)                  # XLU sublane reduce
    xc = x - mean
    var = jnp.mean(xc * xc, axis=0, keepdims=True)
    inv = jax.lax.rsqrt(var + eps)
    g = g_ref[...].astype(jnp.float32)                         # (C, 1)
    b = b_ref[...].astype(jnp.float32)
    o_ref[0] = (xc * inv * g + b).astype(o_ref.dtype)


# ---------------------------------------------------------------------------
# Tile pickers
# ---------------------------------------------------------------------------
_MIN_BLOCK_ELEMS = 64 * 1024     # below this per-step overhead dominates; stop shrinking


def _max_block_elems(itemsize):
    # 2x double-buffered input + output blocks (input dtype) + ~3 f32-sized
    # intermediates (x, xc, y upcast) held by Mosaic.  Keep the total under
    # ~10 MiB so it fits v5e's 16 MiB default scoped VMEM with margin.
    per_elem = 4 * itemsize + 3 * 4
    return (10 << 20) // per_elem


def _pick_chunk_tile(nchunks, c, itemsize, batch):
    """S (in 128-lane chunks) for the dense (B, C, nchunks, 128) layout."""
    if nchunks < 8:
        return nchunks                                    # full-extent block is legal
    s = max(8, min(nchunks, _max_block_elems(itemsize) // (c * 128)) // 8 * 8)
    # Prefer >= 8 total grid steps (v7x: 2 TensorCores) while blocks stay large
    # enough that the ~0.35us per-step overhead stays amortized.
    while (s > 8 and batch * pl.cdiv(nchunks, s) < 8
           and c * (s // 2) * 128 >= _MIN_BLOCK_ELEMS):
        s = max(8, (s // 2) // 8 * 8)
    return s


def _pick_spatial_tile(hw, c, itemsize, batch):
    """Strip length (lanes) for the fallback (B, C, hw) layout (hw % 128 != 0)."""
    if hw <= 128:
        return hw                                         # full extent is legal
    # Floor keeps each per-channel strided-DMA segment >= ~1 KiB.
    floor_t = min(hw // 128 * 128, max(128, 1024 // itemsize))
    t = max(floor_t, min(hw, _max_block_elems(itemsize) // c) // 128 * 128)
    while (t > floor_t and batch * pl.cdiv(hw, t) < 8
           and c * (t // 2) >= _MIN_BLOCK_ELEMS):
        t = max(floor_t, (t // 2) // 128 * 128)
    return t


# ---------------------------------------------------------------------------
# Public wrapper: NCHW in, NCHW out (no transposes, only free reshapes)
# ---------------------------------------------------------------------------
def layernorm2d(x_nchw, gamma, beta, *, eps=1e-6):
    B, C, H, W = x_nchw.shape
    assert gamma.shape == (C,) and beta.shape == (C,)
    hw = H * W
    itemsize = jnp.dtype(x_nchw.dtype).itemsize
    cp = pltpu.CompilerParams(dimension_semantics=("parallel", "parallel"),
                              vmem_limit_bytes=32 << 20)

    if hw % 128 == 0:
        # ---- dense path: spatial folded onto (sublane, lane) ----
        nchunks = hw // 128
        s = _pick_chunk_tile(nchunks, C, itemsize, B)
        x4 = x_nchw.reshape(B, C, nchunks, 128)                       # free reshape
        g4 = jnp.broadcast_to(gamma.reshape(1, C, 1, 1), (1, C, 1, 128))
        b4 = jnp.broadcast_to(beta.reshape(1, C, 1, 1), (1, C, 1, 128))
        out = pl.pallas_call(
            functools.partial(_ln2d_kernel_dense, eps=eps),
            out_shape=jax.ShapeDtypeStruct((B, C, nchunks, 128), x_nchw.dtype),
            grid=(B, pl.cdiv(nchunks, s)),
            in_specs=[
                pl.BlockSpec((1, C, s, 128), lambda b, j: (b, 0, j, 0)),
                pl.BlockSpec((1, C, 1, 128), lambda b, j: (0, 0, 0, 0)),
                pl.BlockSpec((1, C, 1, 128), lambda b, j: (0, 0, 0, 0)),
            ],
            out_specs=pl.BlockSpec((1, C, s, 128), lambda b, j: (b, 0, j, 0)),
            compiler_params=cp,
        )(x4, g4, b4)
        return out.reshape(B, C, H, W)

    # ---- fallback: hw not 128-divisible -> bounded strips, masked last block ----
    t = _pick_spatial_tile(hw, C, itemsize, B)
    x3 = x_nchw.reshape(B, C, hw)                                     # free reshape
    g2 = gamma.reshape(C, 1)
    b2 = beta.reshape(C, 1)
    out = pl.pallas_call(
        functools.partial(_ln2d_kernel_strip, eps=eps),
        out_shape=jax.ShapeDtypeStruct((B, C, hw), x_nchw.dtype),
        grid=(B, pl.cdiv(hw, t)),
        in_specs=[
            pl.BlockSpec((1, C, t), lambda b, j: (b, 0, j)),
            pl.BlockSpec((C, 1), lambda b, j: (0, 0)),
            pl.BlockSpec((C, 1), lambda b, j: (0, 0)),
        ],
        out_specs=pl.BlockSpec((1, C, t), lambda b, j: (b, 0, j)),
        compiler_params=cp,
    )(x3, g2, b2)
    return out.reshape(B, C, H, W)


# ---------------------------------------------------------------------------
# Pure-JAX reference (mirrors the PyTorch forward exactly)
# ---------------------------------------------------------------------------
def layernorm2d_ref(x, gamma, beta, eps=1e-6):
    xt = jnp.transpose(x, (0, 2, 3, 1))                       # NCHW -> NHWC
    mean = jnp.mean(xt, axis=-1, keepdims=True)
    var = jnp.mean((xt - mean) ** 2, axis=-1, keepdims=True)  # biased
    y = (xt - mean) / jnp.sqrt(var + eps) * gamma + beta
    return jnp.transpose(y, (0, 3, 1, 2))                     # NHWC -> NCHW


# ---------------------------------------------------------------------------
if __name__ == "__main__":
    B, C, H, W = 2, 4, 16, 16
    key = jax.random.PRNGKey(0)
    kx, kg, kb = jax.random.split(key, 3)

    x = jax.random.normal(kx, (B, C, H, W), jnp.float32)          # NCHW input
    gamma = 1.0 + 0.1 * jax.random.normal(kg, (C,), jnp.float32)  # LN weight
    beta = 0.1 * jax.random.normal(kb, (C,), jnp.float32)         # LN bias

    out = jax.block_until_ready(layernorm2d(x, gamma, beta))
    ref = jax.block_until_ready(layernorm2d_ref(x, gamma, beta))
    assert out.shape == (B, C, H, W), out.shape
    np.testing.assert_allclose(np.asarray(out), np.asarray(ref), rtol=1e-5, atol=1e-5)

    # Also exercise the non-128-divisible fallback path (hw = 60).
    x2 = jax.random.normal(kx, (1, C, 6, 10), jnp.float32)
    out2 = jax.block_until_ready(layernorm2d(x2, gamma, beta))
    ref2 = layernorm2d_ref(x2, gamma, beta)
    np.testing.assert_allclose(np.asarray(out2), np.asarray(ref2), rtol=1e-5, atol=1e-5)

    print("KERNEL_OK")
</pallas_src>

<mosaic_0001>
module attributes {stable_mosaic.version = 11 : i64} {
  func.func @_ln2d_kernel_dense(%arg0: i32, %arg1: i32, %arg2: memref<1x4x2x128xf32, #tpu.memory_space<vmem>>, %arg3: memref<1x4x1x128xf32, #tpu.memory_space<vmem>>, %arg4: memref<1x4x1x128xf32, #tpu.memory_space<vmem>>, %arg5: memref<1x4x2x128xf32, #tpu.memory_space<vmem>>) attributes {dimension_semantics = [#tpu.dimension_semantics<parallel>, #tpu.dimension_semantics<parallel>], iteration_bounds = array<i64: 2, 1>, scalar_prefetch = 0 : i64, scratch_operands = 0 : i64, tpu.core_type = #tpu.core_type<tc>, window_params = [{transform_indices = @transform_0, window_bounds = array<i64: 1, 4, 2, 128>}, {pipeline_mode = #tpu.pipeline_mode<synchronous>, transform_indices = @transform_1, window_bounds = array<i64: 1, 4, 1, 128>}, {pipeline_mode = #tpu.pipeline_mode<synchronous>, transform_indices = @transform_2, window_bounds = array<i64: 1, 4, 1, 128>}, {transform_indices = @transform_3, window_bounds = array<i64: 1, 4, 2, 128>}]} {
    %c0 = arith.constant 0 : index
    %c0_0 = arith.constant 0 : index
    %c0_1 = arith.constant 0 : index
    %c0_2 = arith.constant 0 : index
    %0 = vector.load %arg2[%c0, %c0_0, %c0_1, %c0_2] : memref<1x4x2x128xf32, #tpu.memory_space<vmem>>, vector<1x4x2x128xf32>
    %cst = arith.constant dense<0.000000e+00> : vector<1x2x128xf32>
    %1 = vector.multi_reduction <add>, %0, %cst [1] : vector<1x4x2x128xf32> to vector<1x2x128xf32>
    %2 = vector.shape_cast %1 : vector<1x2x128xf32> to vector<1x1x2x128xf32>
    %cst_3 = arith.constant 4.000000e+00 : f32
    %3 = vector.broadcast %cst_3 : f32 to vector<1x1x2x128xf32>
    %4 = arith.divf %2, %3 : vector<1x1x2x128xf32>
    %5 = vector.broadcast %4 : vector<1x1x2x128xf32> to vector<1x4x2x128xf32>
    %6 = arith.subf %0, %5 : vector<1x4x2x128xf32>
    %7 = arith.mulf %6, %6 : vector<1x4x2x128xf32>
    %cst_4 = arith.constant dense<0.000000e+00> : vector<1x2x128xf32>
    %8 = vector.multi_reduction <add>, %7, %cst_4 [1] : vector<1x4x2x128xf32> to vector<1x2x128xf32>
    %9 = vector.shape_cast %8 : vector<1x2x128xf32> to vector<1x1x2x128xf32>
    %cst_5 = arith.constant 4.000000e+00 : f32
    %10 = vector.broadcast %cst_5 : f32 to vector<1x1x2x128xf32>
    %11 = arith.divf %9, %10 : vector<1x1x2x128xf32>
    %cst_6 = arith.constant 9.99999997E-7 : f32
    %12 = vector.broadcast %cst_6 : f32 to vector<1x1x2x128xf32>
    %13 = arith.addf %11, %12 : vector<1x1x2x128xf32>
    %14 = math.rsqrt %13 : vector<1x1x2x128xf32>
    %c0_7 = arith.constant 0 : index
    %c0_8 = arith.constant 0 : index
    %c0_9 = arith.constant 0 : index
    %c0_10 = arith.constant 0 : index
    %15 = vector.load %arg3[%c0_7, %c0_8, %c0_9, %c0_10] : memref<1x4x1x128xf32, #tpu.memory_space<vmem>>, vector<1x4x1x128xf32>
    %c0_11 = arith.constant 0 : index
    %c0_12 = arith.constant 0 : index
    %c0_13 = arith.constant 0 : index
    %c0_14 = arith.constant 0 : index
    %16 = vector.load %arg4[%c0_11, %c0_12, %c0_13, %c0_14] : memref<1x4x1x128xf32, #tpu.memory_space<vmem>>, vector<1x4x1x128xf32>
    %17 = vector.broadcast %14 : vector<1x1x2x128xf32> to vector<1x4x2x128xf32>
    %18 = arith.mulf %6, %17 : vector<1x4x2x128xf32>
    %19 = vector.broadcast %15 : vector<1x4x1x128xf32> to vector<1x4x2x128xf32>
    %20 = arith.mulf %18, %19 : vector<1x4x2x128xf32>
    %21 = vector.broadcast %16 : vector<1x4x1x128xf32> to vector<1x4x2x128xf32>
    %22 = arith.addf %20, %21 : vector<1x4x2x128xf32>
    %c0_15 = arith.constant 0 : index
    %c0_16 = arith.constant 0 : index
    %c0_17 = arith.constant 0 : index
    %c0_18 = arith.constant 0 : index
    %23 = vector.load %arg5[%c0_15, %c0_16, %c0_17, %c0_18] : memref<1x4x2x128xf32, #tpu.memory_space<vmem>>, vector<1x4x2x128xf32>
    tpu.vector_store %arg5[%c0_15, %c0_16, %c0_17, %c0_18], %22 {strides = array<i32>} : memref<1x4x2x128xf32, #tpu.memory_space<vmem>>, vector<1x4x2x128xf32>,
    return
  }
  func.func @transform_0(%arg0: i32, %arg1: i32) -> (i32, i32, i32, i32) {
    %c0_i32 = arith.constant 0 : i32
    %c0_i32_0 = arith.constant 0 : i32
    %c0_i32_1 = arith.constant 0 : i32
    return %arg0, %c0_i32, %arg1, %c0_i32_0 : i32, i32, i32, i32
  }
  func.func @transform_1(%arg0: i32, %arg1: i32) -> (i32, i32, i32, i32) {
    %c0_i32 = arith.constant 0 : i32
    %c0_i32_0 = arith.constant 0 : i32
    %c0_i32_1 = arith.constant 0 : i32
    %c0_i32_2 = arith.constant 0 : i32
    %c0_i32_3 = arith.constant 0 : i32
    return %c0_i32, %c0_i32_0, %c0_i32_1, %c0_i32_2 : i32, i32, i32, i32
  }
  func.func @transform_2(%arg0: i32, %arg1: i32) -> (i32, i32, i32, i32) {
    %c0_i32 = arith.constant 0 : i32
    %c0_i32_0 = arith.constant 0 : i32
    %c0_i32_1 = arith.constant 0 : i32
    %c0_i32_2 = arith.constant 0 : i32
    %c0_i32_3 = arith.constant 0 : i32
    return %c0_i32, %c0_i32_0, %c0_i32_1, %c0_i32_2 : i32, i32, i32, i32
  }
  func.func @transform_3(%arg0: i32, %arg1: i32) -> (i32, i32, i32, i32) {
    %c0_i32 = arith.constant 0 : i32
    %c0_i32_0 = arith.constant 0 : i32
    %c0_i32_1 = arith.constant 0 : i32
    return %arg0, %c0_i32, %arg1, %c0_i32_0 : i32, i32, i32, i32
  }
}

</mosaic_0001>

<bundles_post_ra>
// kernel: tpu_custom_call.1
= control target key start
LH: loop header
LB: loop body
LE: loop exit
PB: predicated region body
PF: predicated region fallthrough
CT: control target
= control target key end

     0   :  { %s953_s0 = inlined_call_operand.hbm [shape: f32[2,4,2,128], index: 0, kind: input, shape index: {}]   ;;  %s954_s1 = inlined_call_operand.hbm [shape: f32[1,4,1,128], index: 1, kind: input, shape index: {}]   ;;  %s955_s2 = inlined_call_operand.hbm [shape: f32[1,4,1,128], index: 2, kind: input, shape index: {}]   ;;  %s956_s3 = inlined_call_operand.hbm [shape: f32[2,4,2,128], index: 3, kind: output, shape index: {}]  }
   0x1   :  { %957 = sst [smem:[#allocation12_spill]] %s954_s1 }
   0x2   :  { %8 = vsyncpa [#allocation3], 0 }
   0x3   :  { %10 = vsyncpa [#allocation3 + $0x1], 0 }
   0x4   :  { %11 = vsyncpa [#allocation6], 0 }
   0x5   :  { %12 = vsyncpa [#allocation4], 0 }
   0x6   :  { %14 = vsyncpa [#allocation4 + $0x1], 0  ;;  %s787_s12 = smov 0   ;;  %s789_s13 = smov 0  }
   0x7   :  { %s791_s14 = smov 0   ;;  %s793_s15 = smov 0  }
   0x8   :  { %s795_s16 = smov 0   ;;  %s797_s17 = smov 0  }
   0x9 LB: > { %s457_s18 = sadd.s32 4294967295, %s756_s17   ;;  %s458_s19 = sadd.s32 4294967294, %s756_s17   ;;  %s756_s17 = sphi %s797_s17, %s20_s17   ;;  %s752_s16 = sphi %s795_s16, %s970_s16   ;;  %s748_s15 = sphi %s793_s15, %s969_s15   ;;  %s744_s14 = sphi %s791_s14, %s968_s14   ;;  %s740_s13 = sphi %s789_s13, %s967_s13   ;;  %s736_s12 = sphi %s787_s12, %s966_s12  }
   0xa   : > { %p54_p0 = scmp.ne.s32.totalorder %s740_s13, %s736_s12  ;;  %p821_p1 = scmp.eq.s32.totalorder %s457_s18, 0 }
   0xb   : > { %p825_p2 = scmp.eq.s32.totalorder %s457_s18, 1  ;;  %p128_p3 = scmp.eq.s32.totalorder %s458_s19, 1 }
   0xc   : > { %p831_p4 = por %p821_p1, %p54_p0  ;;  %p459_p5 = scmp.ge.s32.totalorder %s756_s17, 1 }
   0xd   : > { %p836_p6 = por %p128_p3, %p54_p0  ;;  %p135_p7 = scmp.lt.s32.totalorder %s756_s17, 3 }
   0xe   : > { %s962_s1 = sld [smem:[#allocation12_spill]]  ;;  %s758_s28 = smov [#allocation5]  }
   0xf   : > { %p844_p8 = pnand %p459_p5, %p135_p7  ;;  %s148_s29 = sshll.u32 %s758_s28, 4  ;;  %s149_s29 = int_to_ptr.vmem [resolvable:$true] %s148_s29 }
  0x10   : > { %p462_p11 = scmp.ge.s32.totalorder %s756_s17, 2  ;;  %s160_s5 = sshll.u32 %s955_s2, 4  ;;  %s161_s5 = int_to_ptr.hbm [resolvable:$true] %s160_s5 }
  0x11   : > { %p490_p9 = pneg %p844_p8  ;;  %s759_s6 = smov 16  }
  0x12   : > { %s760_s7 = smov 1   ;;  %s761_s8 = smov [#allocation7]  }
  0x13   : > { %p491_p10 = pnand %p490_p9, %p821_p1  ;;  %s162_s9 = sshll.u32 %s761_s8, 4  ;;  %s163_s9 = int_to_ptr.vmem [resolvable:$true] %s162_s9 }
  0x14   : > { %s146_s26 = sshll.u32 %s962_s1, 4  ;;  %s32_s10 = sadd.s32 1, %s752_s16  ;;  %s147_s26 = int_to_ptr.hbm [resolvable:$true] %s146_s26 }
  0x15   : > { %493 = dma.hbm_to_vmem [thread:$0]  (!%p491_p10), %s147_s26, 64, %s149_s29, [#allocation6], %s759_s6, %s759_s6, %s760_s7  }
  0x16   : > { %496 = dma.hbm_to_vmem [thread:$0]  (!%p491_p10), %s161_s5, 64, %s163_s9, [#allocation6], %s759_s6, %s759_s6, %s760_s7  }
  0x17   : > { %s41_s11 = sadd.s32 1, %s744_s14  ;;  %p34_p12 = scmp.ge.s32.totalorder %s32_s10, 2 }
  0x18   : > { %p48_p13 = scmp.ne.s32.totalorder %s744_s14, %s740_s13  ;;  %p49_p0 = scmp.eq.s32.totalorder %s756_s17, 0 }
  0x19   : > { %p507_p3 = scmp.lt.s32.totalorder %s756_s17, 2  ;;  %s972_s10 = smov (%p34_p12, %s32_s10), 0 }
  0x1a   : > { %p864_p5 = por %p49_p0, %p48_p13  ;;  %p870_p7 = por %p825_p2, %p48_p13 }
  0x1b   : > { %s36_s24 = ssub.s32 %s752_s16, %s972_s10  ;;  %s176_s25 = sand.u32 1, %s744_s14  }
  0x1c   : > { %p39_p9 = scmp.eq.s32.totalorder %s36_s24, 0  ;;  %s463_s26 = sshll.u32 %s176_s25, 3 }
  0x1d   : > { %s476_s28 = sshll.u32 %s752_s16, 3  ;;  %s180_s7 = scalar_lea.vmem [#allocation2], %s463_s26 }
  0x1e   : > { %s879_s29 = scalar_select %p39_p9, %s744_s14, %s41_s11  }
  0x1f   : > { %s186_s5 = scalar_lea.hbm %s953_s0, %s476_s28  ;;  %s189_s8 = sshll.u32 %s180_s7, 4  ;;  %s190_s8 = int_to_ptr.vmem [resolvable:$true] %s189_s8 }
  0x20   : > { %s187_s6 = sshll.u32 %s186_s5, 4  ;;  %p498_p2 = pnand %p507_p3, %p864_p5  ;;  %s188_s6 = int_to_ptr.hbm [resolvable:$true] %s187_s6 }
  0x21   : > { %s177_s21 = scalar_lea.sflag [#allocation3], %s176_s25  ;;  %s762_s9 = smov 32  }
  0x22   : > { %s763_s1 = smov 2   ;;  %201 = sbr.rel (%p844_p8) target bundleno = 107 (0x6b), region = 32 }
  0x23   : > { %500 = dma.hbm_to_vmem [thread:$0]  (!%p498_p2), %s188_s6, 128, %s190_s8, %s177_s21, %s762_s9, %s762_s9, %s763_s1  }
  0x24   : > { %s891_s11 = sand.u32 (!%p844_p8), 1, %s740_s13  }
  0x25   : > { %s467_s24 = sshll.u32 (!%p844_p8), %s891_s11, 3  ;;  %s204_s26 = scalar_lea.sflag (!%p844_p8), [#allocation3], %s891_s11 }
  0x26   : > { %s207_s18 = scalar_lea.vmem (!%p844_p8), [#allocation2], %s467_s24 }
  0x27   : > { %723 = dma.done.wait (%p831_p4), %s204_s26, 128  }
  0x28   : > { %725 = vsyncadd (%p831_p4), %s204_s26, 4294967168 }
  0x29   : > { %727 = dma.done.wait (%p821_p1), [#allocation6], 128  }
  0x2a   : > { %729 = vsyncadd (%p821_p1), [#allocation6], 4294967168  ;;  %v764_v0 = vmov 4.0   ;;  %vm245_vm0 = vcmask 1041408   ;;  %v241_v2 = vld [vmem:[%s207_s18] sm:$0x3] }
  0x2b   : > { %576 = vrcp.f32 %v764_v0  ;;  %v242_v3 = vld [vmem:[%s207_s18 + $0x2] sm:$0x3]  ;;  %v243_v4 = vld [vmem:[%s207_s18 + $0x4] sm:$0x3]  ;;  %v244_v5 = vld [vmem:[%s207_s18 + $0x6] sm:$0x3] }
  0x2c   : > { %v246_v6 = vsel %vm245_vm0, %v241_v2, 0.0  ;;  %v247_v7 = vsel %vm245_vm0, %v242_v3, 0.0  ;;  %v249_v8 = vsel %vm245_vm0, %v243_v4, 0.0  ;;  %v251_v11 = vsel %vm245_vm0, %v244_v5, 0.0  ;;  %v568_v42 = vld [vmem:[#allocation5] ss:$0 sm:$0xff] }
  0x2d   : > { %v248_v10 = vadd.f32 %v247_v7, %v246_v6  ;;  %s477_s1 = sshll.u32 %s748_s15, 3  ;;  %v570_v43 = vld [vmem:[#allocation5 + $0x1] ss:$0 sm:$0xff]  ;;  %v572_v44 = vld [vmem:[#allocation5 + $0x2] ss:$0 sm:$0xff]  ;;  %s240_s15 = scalar_lea.vmem [#allocation8], %s467_s24 }
  0x2e   : > { %v574_v45 = vld [vmem:[#allocation5 + $0x3] ss:$0 sm:$0xff]  ;;  %v569_v48 = vld [vmem:[#allocation7] ss:$0 sm:$0xff]  ;;  %v571_v50 = vld [vmem:[#allocation7 + $0x1] ss:$0 sm:$0xff]  ;;  %s349_s27 = scalar_lea.hbm %s956_s3, %s477_s1 }
  0x2f   : > { %v250_v13 = vadd.f32 %v249_v8, %v248_v10  ;;  %v573_v52 = vld [vmem:[#allocation7 + $0x2] ss:$0 sm:$0xff]  ;;  %v575_v54 = vld [vmem:[#allocation7 + $0x3] ss:$0 sm:$0xff]  ;;  %s350_s25 = sshll.u32 %s240_s15, 4  ;;  %s352_s28 = sshll.u32 %s349_s27, 4  ;;  %s351_s25 = int_to_ptr.vmem [resolvable:$true] %s350_s25  ;;  %s353_s28 = int_to_ptr.hbm [resolvable:$true] %s352_s28 }
  0x30   : > { %s337_s30 = scalar_lea.sflag [#allocation4], %s891_s11  ;;  %s684_s4 = sshra.s32 %s353_s28, 4  ;;  %s685_s4 = int_to_ptr.hbm [resolvable:$true] %s684_s4 }
  0x31   : > { %v577_v1 = vpop.eup %576  ;;  %v252_v15 = vadd.f32 %v251_v11, %v250_v13  ;;  %s686_s5 = scalar_lea.hbm %s685_s4, 8  ;;  %s690_s8 = scalar_lea.hbm %s956_s3, 16 }
  0x32   : > { %v254_v9 = vmul.f32 4.0, %v577_v1  ;;  %vm258_vm1 = vweird.f32 %v577_v1  ;;  %p687_p1 = scmp.ne.s32.totalorder %s685_s4, %s686_s5  ;;  %p691_p10 = scmp.lt.s32.totalorder %s685_s4, %s956_s3 }
  0x33   : > { %p692_p12 = scmp.lt.s32.totalorder %s690_s8, %s686_s5 }
  0x34   : > { %v255_v12 = vsub.f32 1.0, %v254_v9  ;;  %p688_p4 = pnand %p687_p1, %p870_p7 }
  0x35   : > { %p693_p13 = por %p692_p12, %p691_p10 }
  0x36   : > { %v256_v14 = vmul.f32 %v577_v1, %v255_v12  ;;  %p689_p8 = pneg %p688_p4 }
  0x38   : > { %v257_v16 = vadd.f32 %v577_v1, %v256_v14  ;;  %p694_p0 = pnand %p693_p13, %p689_p8 }
  0x3a   : > { %v259_v17 = vsel %vm258_vm1, %v577_v1, %v257_v16 }
  0x3b   : > { %v260_v18 = vmul.f32 %v259_v17, %v252_v15 }
  0x3d   : > { %v261_v19 = vsub.f32 %v241_v2, %v260_v18  ;;  %v262_v20 = vsub.f32 %v242_v3, %v260_v18  ;;  %v263_v21 = vsub.f32 %v243_v4, %v260_v18  ;;  %v264_v22 = vsub.f32 %v244_v5, %v260_v18 }
  0x3f   : > { %v265_v23 = vmul.f32 %v261_v19, %v261_v19  ;;  %v266_v24 = vmul.f32 %v262_v20, %v262_v20  ;;  %v267_v25 = vmul.f32 %v263_v21, %v263_v21  ;;  %v268_v26 = vmul.f32 %v264_v22, %v264_v22 }
  0x41   : > { %v269_v27 = vsel %vm245_vm0, %v265_v23, 0.0  ;;  %v270_v28 = vsel %vm245_vm0, %v266_v24, 0.0  ;;  %v272_v29 = vsel %vm245_vm0, %v267_v25, 0.0  ;;  %v274_v31 = vsel %vm245_vm0, %v268_v26, 0.0 }
  0x42   : > { %v271_v30 = vadd.f32 %v270_v28, %v269_v27 }
  0x44   : > { %v273_v32 = vadd.f32 %v272_v29, %v271_v30 }
  0x46   : > { %v275_v33 = vadd.f32 %v274_v31, %v273_v32 }
  0x48   : > { %v276_v34 = vmul.f32 %v275_v33, %v259_v17 }
  0x4a   : > { %v277_v35 = vadd.f32 1e-06, %v276_v34 }
  0x4c   : > { %578 = vrsqrt.f32 %v277_v35  ;;  %vm284_vm2 = vweird.f32 %v277_v35 }
  0x52   : > { %v579_v36 = vpop.eup %578 }
  0x53   : > { %v279_v37 = vmul.f32 %v579_v36, %v277_v35  ;;  %vm285_vm3 = vweird.f32 %v579_v36 }
  0x54   : > { %vm286_vm4 = vmor %vm284_vm2, %vm285_vm3 }
  0x55   : > { %v280_v38 = vmul.f32 %v579_v36, %v279_v37 }
  0x57   : > { %v281_v39 = vmul.f32 0.5, %v280_v38 }
  0x59   : > { %v282_v40 = vsub.f32 1.5, %v281_v39 }
  0x5b   : > { %v283_v41 = vmul.f32 %v579_v36, %v282_v40 }
  0x5d   : > { %v287_v46 = vsel %vm286_vm4, %v579_v36, %v283_v41 }
  0x5e   : > { %v296_v47 = vmul.f32 %v287_v46, %v261_v19  ;;  %v297_v49 = vmul.f32 %v287_v46, %v262_v20  ;;  %v298_v51 = vmul.f32 %v287_v46, %v263_v21  ;;  %v299_v53 = vmul.f32 %v287_v46, %v264_v22 }
  0x60   : > { %v312_v55 = vmul.f32 %v568_v42, %v296_v47  ;;  %v313_v56 = vmul.f32 %v570_v43, %v297_v49  ;;  %v314_v57 = vmul.f32 %v572_v44, %v298_v51  ;;  %v315_v58 = vmul.f32 %v574_v45, %v299_v53 }
  0x62   : > { %v328_v59 = vadd.f32 %v569_v48, %v312_v55  ;;  %v329_v60 = vadd.f32 %v571_v50, %v313_v56  ;;  %v330_v61 = vadd.f32 %v573_v52, %v314_v57  ;;  %v331_v62 = vadd.f32 %v575_v54, %v315_v58 }
  0x64   : > { %332 = vst [vmem:[%s240_s15] sm:$0x3] %v328_v59 }
  0x65   : > { %333 = vst [vmem:[%s240_s15 + $0x2] sm:$0x3] %v329_v60 }
  0x66   : > { %334 = vst [vmem:[%s240_s15 + $0x4] sm:$0x3] %v330_v61 }
  0x67   : > { %335 = vst [vmem:[%s240_s15 + $0x6] sm:$0x3] %v331_v62 }
  0x68   : > { %697 = shalt.err (!%p694_p0)
}
  0x69   : > { %s765_s11 = smov 32   ;;  %s766_s24 = smov 2  }
  0x6a   : > { %488 = dma.vmem_to_hbm [thread:$0]  (%p870_p7), %s351_s25, 128, %s353_s28, %s337_s30, %s765_s11, %s765_s11, %s766_s24  }
  0x6b PF: > { %s367_s26 = sand.u32 1, %s736_s12   ;;  %p502_p3 = pnand %p462_p11, %p836_p6 }
  0x6c   : > { %s368_s18 = scalar_lea.sflag [#allocation4], %s367_s26 }
  0x6d   : > { %p503_p5 = pneg %p502_p3 }
  0x6f   : > { %731 = dma.done.wait (%p503_p5), %s368_s18, 128  }
  0x70   : > { %733 = vsyncadd (%p503_p5), %s368_s18, 4294967168  ;;  %s20_s17 = sadd.s32 1, %s756_s17   ;;  %s966_s12 = smov %s740_s13 }
  0x71   : > { %p17_p9 = scmp.ge.s32.totalorder %s20_s17, 4   ;;  %s967_s13 = smov %s744_s14 }
  0x72   : > { %s968_s14 = smov %s879_s29  ;;  %s969_s15 = smov %s752_s16 }
  0x73   : > { %s970_s16 = smov %s972_s10  ;;  %19 = sbr.rel (!%p17_p9) target bundleno = 9 (0x9), region = 85 }
  0x78   :  { %374 = vsyncpa [#allocation3], 1 }
  0x79   :  { %376 = vsyncpa [#allocation3 + $0x1], 1 }
  0x7a   :  { %377 = vsyncpa [#allocation6], 1 }
  0x7b   :  { %378 = vsyncpa [#allocation4], 1 }
  0x7c   :  { %380 = vsyncpa [#allocation4 + $0x1], 1 }

</bundles_post_ra>
